<compile_context>
chip_gen: v7x
topology: tpu7x:2x2x1
jax: 0.10.0
libtpu: 0.0.40
codegen_flags: <defaults>
</compile_context>

<pallas_src>
import jax
import jax.numpy as jnp
from jax.experimental import pallas as pl
from jax.experimental.pallas import tpu as pltpu

HIDDEN = 256      # module default hidden_size (multiple of 128; fills MXU depth on v6e/v7x)
VOCAB = 32        # input_size (embedding vocab) for the demo
SEQ_LEN = 8       # demo sequence length (encoder loop fused into one kernel)


def encoder_gru_kernel(tok_ref,                      # SMEM: (S,) int32 (scalar prefetch)
                       emb_ref, h0_ref,              # VMEM inputs
                       wih_ref, whh_ref,
                       brz_ref, bin_ref, bhn_ref,
                       out_ref,                      # VMEM output block (1,1,H)
                       h_scr):                       # VMEM scratch (1,H) f32: hidden carry
    del tok_ref  # only consumed by the embedding index_map
    t = pl.program_id(0)
    H = h_scr.shape[-1]

    @pl.when(t == 0)
    def _():
        h_scr[...] = h0_ref[...]

    x = emb_ref[0]          # (1, H) bf16 — this step's embedded token
    h = h_scr[...]          # (1, H) f32 — previous hidden

    # MXU: (1,H) @ (H,3H) -> (1,3H), bf16 operands, f32 accumulation.
    gi = jnp.dot(x, wih_ref[...], preferred_element_type=jnp.float32)
    gh = jnp.dot(h.astype(jnp.bfloat16), whh_ref[...],
                 preferred_element_type=jnp.float32)

    # PyTorch GRU gate order: reset, update, new. All gate math in f32.
    rz = jax.nn.sigmoid(gi[:, :2 * H] + gh[:, :2 * H] + brz_ref[...])
    r = rz[:, :H]
    z = rz[:, H:]
    n = jnp.tanh(gi[:, 2 * H:] + bin_ref[...] + r * (gh[:, 2 * H:] + bhn_ref[...]))
    h_new = (1.0 - z) * n + z * h

    h_scr[...] = h_new                       # carry to next grid step
    out_ref[0] = h_new.astype(out_ref.dtype)  # per-step GRU output (== new hidden)


def encoder_gru(tokens, h0, emb3d, w_ih, w_hh, b_rz, b_in, b_hn):
    """Run the whole sequence in one pallas_call. Returns (S, 1, H) f32 outputs."""
    seq_len = tokens.shape[0]
    H = h0.shape[-1]

    grid_spec = pltpu.PrefetchScalarGridSpec(
        num_scalar_prefetch=1,          # tokens -> SMEM, visible to index_maps
        grid=(seq_len,),
        in_specs=[
            # Embedding row for this step: block index = token id (block rows of 1).
            pl.BlockSpec((1, 1, H), lambda t, toks: (toks[t], 0, 0)),
            # Initial hidden + weights/biases: constant block index -> stay resident.
            pl.BlockSpec((1, H), lambda t, toks: (0, 0)),
            pl.BlockSpec((H, 3 * H), lambda t, toks: (0, 0)),
            pl.BlockSpec((H, 3 * H), lambda t, toks: (0, 0)),
            pl.BlockSpec((1, 2 * H), lambda t, toks: (0, 0)),
            pl.BlockSpec((1, H), lambda t, toks: (0, 0)),
            pl.BlockSpec((1, H), lambda t, toks: (0, 0)),
        ],
        out_specs=pl.BlockSpec((1, 1, H), lambda t, toks: (t, 0, 0)),
        scratch_shapes=[pltpu.VMEM((1, H), jnp.float32)],
    )

    return pl.pallas_call(
        encoder_gru_kernel,
        out_shape=jax.ShapeDtypeStruct((seq_len, 1, H), jnp.float32),
        grid_spec=grid_spec,
        compiler_params=pltpu.CompilerParams(
            dimension_semantics=("arbitrary",),   # time recurrence is serial
        ),
    )(tokens, emb3d, h0, w_ih, w_hh, b_rz, b_in, b_hn)


class EncoderRNNPallas:
    """JAX/Pallas port of the PyTorch EncoderRNN forward pass (seq loop fused)."""

    def __init__(self, input_size, hidden_size, key):
        self.hidden_size = hidden_size
        H = hidden_size
        k_emb, k_wih, k_whh, k_bih, k_bhh = jax.random.split(key, 5)

        # nn.Embedding default init: N(0, 1). Stored bf16, shaped (V, 1, H) so the
        # per-row gather block's last two dims equal the full array dims.
        self.embedding = jax.random.normal(
            k_emb, (input_size, H), dtype=jnp.float32
        ).astype(jnp.bfloat16).reshape(input_size, 1, H)

        # nn.GRU default init: U(-1/sqrt(H), 1/sqrt(H)); stored transposed (H, 3H), bf16.
        bound = 1.0 / (H ** 0.5)
        self.w_ih = jax.random.uniform(k_wih, (H, 3 * H), minval=-bound, maxval=bound,
                                       dtype=jnp.float32).astype(jnp.bfloat16)
        self.w_hh = jax.random.uniform(k_whh, (H, 3 * H), minval=-bound, maxval=bound,
                                       dtype=jnp.float32).astype(jnp.bfloat16)
        b_ih = jax.random.uniform(k_bih, (1, 3 * H), minval=-bound, maxval=bound,
                                  dtype=jnp.float32)
        b_hh = jax.random.uniform(k_bhh, (1, 3 * H), minval=-bound, maxval=bound,
                                  dtype=jnp.float32)
        # Pre-fold r/z biases; keep n-gate biases separate (needs r * (h_n + b_hn)).
        self.b_rz = b_ih[:, :2 * H] + b_hh[:, :2 * H]
        self.b_in = b_ih[:, 2 * H:]
        self.b_hn = b_hh[:, 2 * H:]

    def init_hidden(self):
        return jnp.zeros((1, 1, self.hidden_size), dtype=jnp.float32)

    def __call__(self, tokens, hidden):
        tokens = jnp.atleast_1d(jnp.asarray(tokens, dtype=jnp.int32))
        h0 = hidden.reshape(1, self.hidden_size).astype(jnp.float32)
        outputs = encoder_gru(tokens, h0, self.embedding, self.w_ih, self.w_hh,
                              self.b_rz, self.b_in, self.b_hn)      # (S, 1, H)
        new_hidden = outputs[-1].reshape(1, 1, self.hidden_size)     # (1, 1, H)
        return outputs, new_hidden


def _reference_encoder(tokens, h0, emb3d, w_ih, w_hh, b_rz, b_in, b_hn):
    """Pure-JAX reference replicating the kernel's math (bf16 matmuls, f32 gates)."""
    H = h0.shape[-1]
    h = h0.astype(jnp.float32)
    outs = []
    for t in list(tokens):
        x = emb3d[t]                                   # (1, H) bf16
        gi = jnp.dot(x, w_ih, preferred_element_type=jnp.float32)
        gh = jnp.dot(h.astype(jnp.bfloat16), w_hh, preferred_element_type=jnp.float32)
        rz = jax.nn.sigmoid(gi[:, :2 * H] + gh[:, :2 * H] + b_rz)
        r, z = rz[:, :H], rz[:, H:]
        n = jnp.tanh(gi[:, 2 * H:] + b_in + r * (gh[:, 2 * H:] + b_hn))
        h = (1.0 - z) * n + z * h
        outs.append(h)
    return jnp.stack(outs)                             # (S, 1, H)


if __name__ == "__main__":
    key = jax.random.PRNGKey(0)
    k_model, k_tok = jax.random.split(key)

    enc = EncoderRNNPallas(VOCAB, HIDDEN, k_model)
    tokens = jax.random.randint(k_tok, (SEQ_LEN,), 0, VOCAB, dtype=jnp.int32)
    hidden = enc.init_hidden()                         # (1, 1, H) zeros

    outputs, new_hidden = enc(tokens, hidden)
    outputs = jax.block_until_ready(outputs)
    new_hidden = jax.block_until_ready(new_hidden)

    assert outputs.shape == (SEQ_LEN, 1, HIDDEN)
    assert new_hidden.shape == (1, 1, HIDDEN)

    ref = _reference_encoder(tokens, hidden.reshape(1, HIDDEN), enc.embedding,
                             enc.w_ih, enc.w_hh, enc.b_rz, enc.b_in, enc.b_hn)
    assert jnp.allclose(outputs, ref, atol=1e-3, rtol=1e-3)
    assert jnp.allclose(new_hidden.reshape(1, HIDDEN), ref[-1], atol=1e-3, rtol=1e-3)

    print("KERNEL_OK")
</pallas_src>

<mosaic_0001>
module attributes {stable_mosaic.version = 11 : i64} {
  func.func @encoder_gru_kernel(%arg0: i32, %arg1: memref<8xi32, #tpu.memory_space<smem>>, %arg2: memref<1x1x256xbf16, #tpu.memory_space<vmem>>, %arg3: memref<1x256xf32, #tpu.memory_space<vmem>>, %arg4: memref<256x768xbf16, #tpu.memory_space<vmem>>, %arg5: memref<256x768xbf16, #tpu.memory_space<vmem>>, %arg6: memref<1x512xf32, #tpu.memory_space<vmem>>, %arg7: memref<1x256xf32, #tpu.memory_space<vmem>>, %arg8: memref<1x256xf32, #tpu.memory_space<vmem>>, %arg9: memref<1x1x256xf32, #tpu.memory_space<vmem>>, %arg10: memref<1x256xf32, #tpu.memory_space<vmem>>) attributes {dimension_semantics = [#tpu.dimension_semantics<arbitrary>], iteration_bounds = array<i64: 8>, scalar_prefetch = 1 : i64, scratch_operands = 1 : i64, tpu.core_type = #tpu.core_type<tc>, window_params = [{transform_indices = @transform_0, window_bounds = array<i64: 1, 1, 256>}, {pipeline_mode = #tpu.pipeline_mode<synchronous>, transform_indices = @transform_1, window_bounds = array<i64: 1, 256>}, {pipeline_mode = #tpu.pipeline_mode<synchronous>, transform_indices = @transform_2, window_bounds = array<i64: 256, 768>}, {pipeline_mode = #tpu.pipeline_mode<synchronous>, transform_indices = @transform_3, window_bounds = array<i64: 256, 768>}, {pipeline_mode = #tpu.pipeline_mode<synchronous>, transform_indices = @transform_4, window_bounds = array<i64: 1, 512>}, {pipeline_mode = #tpu.pipeline_mode<synchronous>, transform_indices = @transform_5, window_bounds = array<i64: 1, 256>}, {pipeline_mode = #tpu.pipeline_mode<synchronous>, transform_indices = @transform_6, window_bounds = array<i64: 1, 256>}, {transform_indices = @transform_7, window_bounds = array<i64: 1, 1, 256>}]} {
    %c0_i32 = arith.constant 0 : i32
    %0 = arith.cmpi eq, %arg0, %c0_i32 : i32
    %1 = arith.extui %0 : i1 to i32
    %c0_i32_0 = arith.constant 0 : i32
    %2 = arith.cmpi ne, %1, %c0_i32_0 : i32
    scf.if %2 {
      %c0_23 = arith.constant 0 : index
      %c0_24 = arith.constant 0 : index
      %41 = vector.load %arg3[%c0_23, %c0_24] : memref<1x256xf32, #tpu.memory_space<vmem>>, vector<1x256xf32>
      %c0_25 = arith.constant 0 : index
      %c0_26 = arith.constant 0 : index
      %42 = vector.load %arg10[%c0_25, %c0_26] : memref<1x256xf32, #tpu.memory_space<vmem>>, vector<1x256xf32>
      tpu.vector_store %arg10[%c0_25, %c0_26], %41 {strides = array<i32>} : memref<1x256xf32, #tpu.memory_space<vmem>>, vector<1x256xf32>,
    } else {
    }
    %c0 = arith.constant 0 : index
    %c0_1 = arith.constant 0 : index
    %c0_2 = arith.constant 0 : index
    %3 = vector.load %arg2[%c0, %c0_1, %c0_2] : memref<1x1x256xbf16, #tpu.memory_space<vmem>>, vector<1x1x256xbf16>
    %4 = vector.shape_cast %3 : vector<1x1x256xbf16> to vector<1x256xbf16>
    %c0_3 = arith.constant 0 : index
    %c0_4 = arith.constant 0 : index
    %5 = vector.load %arg10[%c0_3, %c0_4] : memref<1x256xf32, #tpu.memory_space<vmem>>, vector<1x256xf32>
    %c0_5 = arith.constant 0 : index
    %c0_6 = arith.constant 0 : index
    %6 = vector.load %arg4[%c0_5, %c0_6] : memref<256x768xbf16, #tpu.memory_space<vmem>>, vector<256x768xbf16>
    %cst = arith.constant dense<0.000000e+00> : vector<1x768xf32>
    %7 = tpu.matmul %4, %6, %cst {dimension_numbers = #tpu.dot_dimension_numbers<[1], [0], [0], [1], [0, 0, 1, 1], [], []>} : vector<1x256xbf16>, vector<256x768xbf16>, vector<1x768xf32> -> vector<1x768xf32>
    %8 = arith.truncf %5 : vector<1x256xf32> to vector<1x256xbf16>
    %c0_7 = arith.constant 0 : index
    %c0_8 = arith.constant 0 : index
    %9 = vector.load %arg5[%c0_7, %c0_8] : memref<256x768xbf16, #tpu.memory_space<vmem>>, vector<256x768xbf16>
    %cst_9 = arith.constant dense<0.000000e+00> : vector<1x768xf32>
    %10 = tpu.matmul %8, %9, %cst_9 {dimension_numbers = #tpu.dot_dimension_numbers<[1], [0], [0], [1], [0, 0, 1, 1], [], []>} : vector<1x256xbf16>, vector<256x768xbf16>, vector<1x768xf32> -> vector<1x768xf32>
    %11 = vector.extract_strided_slice %7 {offsets = [0, 0], sizes = [1, 512], strides = [1, 1]} : vector<1x768xf32> to vector<1x512xf32>
    %12 = vector.extract_strided_slice %10 {offsets = [0, 0], sizes = [1, 512], strides = [1, 1]} : vector<1x768xf32> to vector<1x512xf32>
    %13 = arith.addf %11, %12 : vector<1x512xf32>
    %c0_10 = arith.constant 0 : index
    %c0_11 = arith.constant 0 : index
    %14 = vector.load %arg6[%c0_10, %c0_11] : memref<1x512xf32, #tpu.memory_space<vmem>>, vector<1x512xf32>
    %15 = arith.addf %13, %14 : vector<1x512xf32>
    %16 = arith.negf %15 : vector<1x512xf32>
    %17 = math.exp %16 : vector<1x512xf32>
    %cst_12 = arith.constant 1.000000e+00 : f32
    %18 = vector.broadcast %cst_12 : f32 to vector<1x512xf32>
    %19 = arith.addf %18, %17 : vector<1x512xf32>
    %20 = arith.divf %18, %19 : vector<1x512xf32>
    %21 = vector.extract_strided_slice %20 {offsets = [0, 0], sizes = [1, 256], strides = [1, 1]} : vector<1x512xf32> to vector<1x256xf32>
    %22 = vector.extract_strided_slice %20 {offsets = [0, 256], sizes = [1, 256], strides = [1, 1]} : vector<1x512xf32> to vector<1x256xf32>
    %23 = vector.extract_strided_slice %7 {offsets = [0, 512], sizes = [1, 256], strides = [1, 1]} : vector<1x768xf32> to vector<1x256xf32>
    %c0_13 = arith.constant 0 : index
    %c0_14 = arith.constant 0 : index
    %24 = vector.load %arg7[%c0_13, %c0_14] : memref<1x256xf32, #tpu.memory_space<vmem>>, vector<1x256xf32>
    %25 = arith.addf %23, %24 : vector<1x256xf32>
    %26 = vector.extract_strided_slice %10 {offsets = [0, 512], sizes = [1, 256], strides = [1, 1]} : vector<1x768xf32> to vector<1x256xf32>
    %c0_15 = arith.constant 0 : index
    %c0_16 = arith.constant 0 : index
    %27 = vector.load %arg8[%c0_15, %c0_16] : memref<1x256xf32, #tpu.memory_space<vmem>>, vector<1x256xf32>
    %28 = arith.addf %26, %27 : vector<1x256xf32>
    %29 = arith.mulf %21, %28 : vector<1x256xf32>
    %30 = arith.addf %25, %29 : vector<1x256xf32>
    %31 = math.tanh %30 : vector<1x256xf32>
    %cst_17 = arith.constant 1.000000e+00 : f32
    %32 = vector.broadcast %cst_17 : f32 to vector<1x256xf32>
    %33 = arith.subf %32, %22 : vector<1x256xf32>
    %34 = arith.mulf %33, %31 : vector<1x256xf32>
    %35 = arith.mulf %22, %5 : vector<1x256xf32>
    %36 = arith.addf %34, %35 : vector<1x256xf32>
    %c0_18 = arith.constant 0 : index
    %c0_19 = arith.constant 0 : index
    %37 = vector.load %arg10[%c0_18, %c0_19] : memref<1x256xf32, #tpu.memory_space<vmem>>, vector<1x256xf32>
    tpu.vector_store %arg10[%c0_18, %c0_19], %36 {strides = array<i32>} : memref<1x256xf32, #tpu.memory_space<vmem>>, vector<1x256xf32>,
    %c0_20 = arith.constant 0 : index
    %c0_21 = arith.constant 0 : index
    %c0_22 = arith.constant 0 : index
    %38 = vector.load %arg9[%c0_20, %c0_21, %c0_22] : memref<1x1x256xf32, #tpu.memory_space<vmem>>, vector<1x1x256xf32>
    %39 = vector.shape_cast %38 : vector<1x1x256xf32> to vector<1x256xf32>
    %40 = vector.shape_cast %36 : vector<1x256xf32> to vector<1x1x256xf32>
    tpu.vector_store %arg9[%c0_20, %c0_21, %c0_22], %40 {strides = array<i32>} : memref<1x1x256xf32, #tpu.memory_space<vmem>>, vector<1x1x256xf32>,
    return
  }
  func.func @transform_0(%arg0: i32, %arg1: memref<8xi32, #tpu.memory_space<smem>>) -> (i32, i32, i32) {
    %0 = arith.index_cast %arg0 : i32 to index
    %1 = memref.load %arg1[%0] : memref<8xi32, #tpu.memory_space<smem>>
    %c0_i32 = arith.constant 0 : i32
    %c0_i32_0 = arith.constant 0 : i32
    %c0_i32_1 = arith.constant 0 : i32
    return %1, %c0_i32, %c0_i32_0 : i32, i32, i32
  }
  func.func @transform_1(%arg0: i32, %arg1: memref<8xi32, #tpu.memory_space<smem>>) -> (i32, i32) {
    %c0_i32 = arith.constant 0 : i32
    %c0_i32_0 = arith.constant 0 : i32
    %c0_i32_1 = arith.constant 0 : i32
    return %c0_i32, %c0_i32_0 : i32, i32
  }
  func.func @transform_2(%arg0: i32, %arg1: memref<8xi32, #tpu.memory_space<smem>>) -> (i32, i32) {
    %c0_i32 = arith.constant 0 : i32
    %c0_i32_0 = arith.constant 0 : i32
    %c0_i32_1 = arith.constant 0 : i32
    return %c0_i32, %c0_i32_0 : i32, i32
  }
  func.func @transform_3(%arg0: i32, %arg1: memref<8xi32, #tpu.memory_space<smem>>) -> (i32, i32) {
    %c0_i32 = arith.constant 0 : i32
    %c0_i32_0 = arith.constant 0 : i32
    %c0_i32_1 = arith.constant 0 : i32
    return %c0_i32, %c0_i32_0 : i32, i32
  }
  func.func @transform_4(%arg0: i32, %arg1: memref<8xi32, #tpu.memory_space<smem>>) -> (i32, i32) {
    %c0_i32 = arith.constant 0 : i32
    %c0_i32_0 = arith.constant 0 : i32
    %c0_i32_1 = arith.constant 0 : i32
    return %c0_i32, %c0_i32_0 : i32, i32
  }
  func.func @transform_5(%arg0: i32, %arg1: memref<8xi32, #tpu.memory_space<smem>>) -> (i32, i32) {
    %c0_i32 = arith.constant 0 : i32
    %c0_i32_0 = arith.constant 0 : i32
    %c0_i32_1 = arith.constant 0 : i32
    return %c0_i32, %c0_i32_0 : i32, i32
  }
  func.func @transform_6(%arg0: i32, %arg1: memref<8xi32, #tpu.memory_space<smem>>) -> (i32, i32) {
    %c0_i32 = arith.constant 0 : i32
    %c0_i32_0 = arith.constant 0 : i32
    %c0_i32_1 = arith.constant 0 : i32
    return %c0_i32, %c0_i32_0 : i32, i32
  }
  func.func @transform_7(%arg0: i32, %arg1: memref<8xi32, #tpu.memory_space<smem>>) -> (i32, i32, i32) {
    %c0_i32 = arith.constant 0 : i32
    %c0_i32_0 = arith.constant 0 : i32
    %c0_i32_1 = arith.constant 0 : i32
    return %arg0, %c0_i32, %c0_i32_0 : i32, i32, i32
  }
}

</mosaic_0001>

<bundles_post_ra>
// kernel: tpu_custom_call.1
= control target key start
LH: loop header
LB: loop body
LE: loop exit
PB: predicated region body
PF: predicated region fallthrough
CT: control target
= control target key end

     0   :  { %s3021_s0 = inlined_call_operand.vmem [shape: s32[8], index: 0, kind: input, shape index: {}]   ;;  %s3022_s1 = inlined_call_operand.vmem [shape: bf16[32,1,256], index: 1, kind: input, shape index: {}]   ;;  %s3023_s2 = inlined_call_operand.vmem [shape: f32[1,256], index: 2, kind: input, shape index: {}]   ;;  %s3024_s3 = inlined_call_operand.hbm [shape: bf16[256,768], index: 3, kind: input, shape index: {}]   ;;  %s3025_s4 = inlined_call_operand.hbm [shape: bf16[256,768], index: 4, kind: input, shape index: {}]   ;;  %s3026_s5 = inlined_call_operand.vmem [shape: f32[1,512], index: 5, kind: input, shape index: {}]   ;;  %s3027_s6 = inlined_call_operand.vmem [shape: f32[1,256], index: 6, kind: input, shape index: {}]   ;;  %s3028_s7 = inlined_call_operand.vmem [shape: f32[1,256], index: 7, kind: input, shape index: {}]   ;;  %s3029_s8 = inlined_call_operand.hbm [shape: f32[8,1,256], index: 8, kind: output, shape index: {}]  }
   0x1   :  { %s13_s29 = sshll.u32 %s3021_s0, 4  ;;  %s14_s29 = int_to_ptr.vmem [resolvable:$true] %s13_s29 }
   0x2   :  { %s2568_s30 = scalar_lea.vmem %s14_s29, 16  ;;  %p2573_p1 = scmp.lt.s32.totalorder %s14_s29, %s14_s29 }
   0x3   :  { %p2569_p0 = scmp.ne.s32.totalorder %s14_s29, %s2568_s30  ;;  %p2574_p2 = scmp.lt.s32.totalorder %s2568_s30, %s2568_s30 }
   0x5   :  { %p2575_p3 = por %p2574_p2, %p2573_p1 }
   0x7   :  { %p2576_p4 = pnand %p2575_p3, %p2569_p0 }
   0x9   :  { %2579 = shalt.err (!%p2576_p4)  }
   0xa   :  { %s2710_s9 = smov [#allocation4]  }
   0xb   :  { %16 = dma.vmem_to_smem %s14_s29, 16, %s2710_s9, [#allocation3] }
   0xc   :  { %2680 = dma.done.wait [#allocation3], 16 }
   0xd   :  { %2681 = vsyncadd [#allocation3], 4294967280 }
   0xe   :  { %18 = sfence }
   0xf   :  { %19 = vsyncpa [#allocation6], 0 }
  0x10   :  { %20 = vsyncpa [#allocation9], 0 }
  0x11   :  { %21 = vsyncpa [#allocation7], 0 }
  0x12   :  { %23 = vsyncpa [#allocation7 + $0x1], 0  ;;  %s2765_s10 = smov 0   ;;  %s2767_s0 = smov 0  }
  0x13   :  { %s2769_s11 = smov 0   ;;  %s2771_s12 = smov 0  }
  0x14 LB: > { %s2786_s13 = sadd.s32 4294967295, %s2708_s12   ;;  %s1982_s14 = sadd.s32 4294967294, %s2708_s12   ;;  %s2708_s12 = sphi %s2771_s12, %s3050_s12   ;;  %s2704_s11 = sphi %s2769_s11, %s3049_s11   ;;  %s2700_s0 = sphi %s2767_s0, %s3048_s0   ;;  %s2696_s10 = sphi %s2765_s10, %s3047_s10  }
  0x15   : > { %s2790_s15 = sadd.s32 1, %s2708_s12   ;;  %s190_s16 = sadd.s32 1, %s2704_s11 }
  0x16   : > { %s187_s17 = ssub.s32 %s2708_s12, %s2790_s15  ;;  %p200_p5 = scmp.ne.s32.totalorder %s2704_s11, %s2700_s0 }
  0x17   : > { %p188_p6 = scmp.eq.s32.totalorder %s187_s17, 0  ;;  %p201_p7 = scmp.eq.s32.totalorder %s2786_s13, 7 }
  0x18   : > { %p206_p8 = scmp.ne.s32.totalorder %s2700_s0, %s2696_s10  ;;  %p207_p9 = scmp.eq.s32.totalorder %s1982_s14, 7 }
  0x19   : > { %s2801_s18 = scalar_select %p188_p6, %s2704_s11, %s190_s16  }
  0x1a   : > { %p2803_p10 = por %p201_p7, %p200_p5  ;;  %p2807_p11 = por %p207_p9, %p206_p8 }
  0x1b   : > { %3033 = sst [smem:[#allocation15_spill]] %s2801_s18  ;;  %p1983_p12 = scmp.ge.s32.totalorder %s2708_s12, 1 }
  0x1c   : > { %s3034_s19 = scalar_select %p2803_p10, 1, 0 }
  0x1d   : > { %s3035_s20 = scalar_select %p2807_p11, 1, 0 }
  0x1e   : > { %p214_p13 = scmp.lt.s32.totalorder %s2708_s12, 9  ;;  %p3030_p1 = scmp.eq.s32.totalorder %s2786_s13, 0 }
  0x1f   : > { %s2711_s22 = smov [#allocation5]   ;;  %s2712_s25 = smov [#allocation8]  }
  0x20   : > { %p2815_p2 = pnand %p1983_p12, %p214_p13  ;;  %s229_s23 = sshll.u32 %s2711_s22, 4  ;;  %s230_s23 = int_to_ptr.vmem [resolvable:$true] %s229_s23 }
  0x21   : > { %s242_s26 = sshll.u32 %s2712_s25, 4  ;;  %s2580_s29 = scalar_lea.hbm %s3024_s3, 12288  ;;  %s2827_s26 = int_to_ptr.vmem [resolvable:$true] %s242_s26 }
  0x22   : > { %s3036_s21 = scalar_select %p2815_p2, 1, 0 }
  0x23   : > { %p2206_p3 = pneg %p2815_p2  ;;  %p2581_p5 = scmp.ne.s32.totalorder %s3024_s3, %s2580_s29 }
  0x24   : > { %p2587_p9 = scmp.lt.u32.totalorder %s2580_s29, %s3024_s3 }
  0x25   : > { %p2823_p4 = pnand %p3030_p1, %p2206_p3 }
  0x27   : > { %p2582_p6 = pneg %p2823_p4 }
  0x29   : > { %p2583_p7 = pnand %p2582_p6, %p2581_p5 }
  0x2b   : > { %p2584_p8 = pneg %p2583_p7 }
  0x2d   : > { %p2589_p12 = pnand %p2587_p9, %p2584_p8 }
  0x2f   : > { %2592 = shalt.err (!%p2589_p12)
}
  0x30   : > { %s2593_s17 = scalar_lea.vmem %s230_s23, 12288  ;;  %p2601_p1 = scmp.lt.s32.totalorder %s230_s23, %s230_s23 }
  0x31   : > { %p2594_p13 = scmp.ne.s32.totalorder %s230_s23, %s2593_s17  ;;  %p2602_p11 = scmp.lt.s32.totalorder %s2593_s17, %s2593_s17 }
  0x33   : > { %p2596_p3 = pnand %p2594_p13, %p2582_p6  ;;  %p2603_p10 = por %p2602_p11, %p2601_p1 }
  0x35   : > { %p2597_p0 = pneg %p2596_p3 }
  0x37   : > { %p2604_p2 = pnand %p2603_p10, %p2597_p0 }
  0x39   : > { %2607 = shalt.err (!%p2604_p2)
}
  0x3a   : > { %s2713_s22 = smov 384   ;;  %s2714_s25 = smov 24  }
  0x3b   : > { %2209 = dma.hbm_to_vmem [thread:$0]  (!%p2823_p4), %s3024_s3, 12288, %s230_s23, [#allocation6], %s2713_s22, %s2713_s22, %s2714_s25  }
  0x3c   : > { %s2608_s9 = scalar_lea.hbm %s3025_s4, 12288 }
  0x3d   : > { %p2609_p5 = scmp.ne.s32.totalorder %s3025_s4, %s2608_s9  ;;  %p2615_p0 = scmp.lt.u32.totalorder %s2608_s9, %s3025_s4 }
  0x3f   : > { %p2611_p10 = pnand %p2609_p5, %p2582_p6 }
  0x41   : > { %p2612_p11 = pneg %p2611_p10 }
  0x43   : > { %p2617_p1 = pnand %p2615_p0, %p2612_p11 }
  0x45   : > { %2620 = shalt.err (!%p2617_p1)
}
  0x46   : > { %s2621_s23 = scalar_lea.vmem %s2827_s26, 12288  ;;  %p2629_p9 = scmp.lt.s32.totalorder %s2827_s26, %s2827_s26 }
  0x47   : > { %p2622_p2 = scmp.ne.s32.totalorder %s2827_s26, %s2621_s23  ;;  %p2630_p12 = scmp.lt.s32.totalorder %s2621_s23, %s2621_s23 }
  0x49   : > { %p2624_p7 = pnand %p2622_p2, %p2582_p6  ;;  %p2631_p13 = por %p2630_p12, %p2629_p9 }
  0x4b   : > { %p2625_p8 = pneg %p2624_p7 }
  0x4d   : > { %p2632_p3 = pnand %p2631_p13, %p2625_p8 }
  0x4f   : > { %2635 = shalt.err (!%p2632_p3)
}
  0x50   : > { %2212 = dma.hbm_to_vmem [thread:$0]  (!%p2823_p4), %s3025_s4, 12288, %s2827_s26, [#allocation9], %s2713_s22, %s2713_s22, %s2714_s25  }
  0x51   : > { %p3038_p5 = scmp.ne.s32.totalorder %s3036_s21, 0 }
  0x52   : > { %p3039_p10 = scmp.eq.s32.totalorder (!%p3038_p5), %s2786_s13, 0 }
  0x53   : > { %276 = sbr.rel (%p3038_p5) target bundleno = 569 (0x239), region = 48 }
  0x5a   : > { %2683 = dma.done.wait (%p3039_p10), [#allocation6], 12288   ;;  %p3040_p6 = pmov %p3039_p10 }
  0x5c   : > { %2685 = vsyncadd (%p3040_p6), [#allocation6], 4294955008  ;;  %p3041_p11 = pmov %p3040_p6 }
  0x5d   : > { %p3042_p0 = pmov %p3040_p6 }
  0x5e   : > { %2687 = dma.done.wait (%p3041_p11), [#allocation9], 12288  }
  0x5f   : > { %2689 = vsyncadd (%p3042_p0), [#allocation9], 4294955008  ;;  %s309_s24 = sand.u32 1, %s2700_s0   ;;  %s312_s26 = sld [smem:[#allocation4 + %s2786_s13]] }
  0x60   : > { %s2890_s21 = sshll.u32 %s309_s24, 1  ;;  %p3043_p1 = scmp.ne.s32.totalorder %s2786_s13, 0 }
  0x61   : > { %s311_s30 = scalar_lea.vmem [#allocation10], %s2890_s21  ;;  %v322_v0 = vld [vmem:[%s3023_s2] sm:$0x3] (!%p3043_p1)  ;;  %v323_v1 = vlaneseq (!%p3043_p1) }
  0x63   : > { %321 = sbr.rel (%p3043_p1) target bundleno = 106 (0x6a), region = 60  ;;  %vm325_vm0 = vcmp.lt.s32.totalorder (!%p3043_p1), %v323_v1, 256 }
  0x64   : > { %327 = vst.msk [vmem:[#allocation2] sm:$0x3] (!%p3043_p1), %vm325_vm0, %v322_v0 }
  0x65   : > { %p313_p4 = scmp.lt.s32.totalorder %s312_s26, 31 }
  0x67   : > { %s3052_s26 = smov (!%p313_p4, %s312_s26), 31 }
  0x68   : > { %s1991_s22 = sshll.u32 %s3052_s26, 1 }
  0x69   : > { %s2895_s29 = scalar_lea.vmem %s3022_s1, %s1991_s22 }
  0x6a PF: > { %v2260_v2 = vld [vmem:[#allocation5 + $0x4] ss:$24 sps:$4 sm:$0xff]   ;;  %v2264_v4 = vld [vmem:[#allocation5] ss:$24 sps:$4 sm:$0xff]   ;;  %v2266_v6 = vld [vmem:[#allocation5 + $0x34] ss:$24 sps:$4 sm:$0xff]   ;;  %v438_v42 = vlaneseq }
  0x6b   : > { %v2262_v3 = vld [vmem:[#allocation5 + $0xc] ss:$24 sps:$4 sm:$0xff]   ;;  %931 = vmatprep.subr.bf16.mxu0 %v2260_v2  ;;  %v2265_v5 = vld [vmem:[#allocation5 + $0x8] ss:$24 sps:$4 sm:$0xff]   ;;  %v2268_v7 = vld [vmem:[#allocation5 + $0x3c] ss:$24 sps:$4 sm:$0xff]  }
  0x6c   : > { %972 = vmatprep.subr.bf16.mxu1 %v2262_v3  ;;  %932 = vmatpush1.bf16.msra.mxu0 %v2264_v4  ;;  %v2270_v8 = vld [vmem:[#allocation5 + $0x30] ss:$24 sps:$4 sm:$0xff]   ;;  %v2272_v10 = vld [vmem:[#allocation5 + $0x64] ss:$24 sps:$4 sm:$0xff]   ;;  %v2276_v12 = vld [vmem:[#allocation5 + $0x60] ss:$24 sps:$4 sm:$0xff]  }
  0x6d   : > { %973 = vmatpush1.bf16.msra.mxu1 %v2265_v5  ;;  %933 = vmatprep.subr.bf16.mxu0 %v2266_v6  ;;  %v2271_v9 = vld [vmem:[#allocation5 + $0x38] ss:$24 sps:$4 sm:$0xff]   ;;  %v2274_v11 = vld [vmem:[#allocation5 + $0x6c] ss:$24 sps:$4 sm:$0xff]   ;;  %v2277_v13 = vld [vmem:[#allocation5 + $0x68] ss:$24 sps:$4 sm:$0xff]  }
  0x6e   : > { %974 = vmatprep.subr.bf16.mxu1 %v2268_v7  ;;  %v2278_v14 = vld [vmem:[#allocation5 + $0x94] ss:$24 sps:$4 sm:$0xff]   ;;  %v2282_v16 = vld [vmem:[#allocation5 + $0x90] ss:$24 sps:$4 sm:$0xff]   ;;  %v2284_v18 = vld [vmem:[#allocation5 + $0xc4] ss:$24 sps:$4 sm:$0xff]  }
  0x6f   : > { %v2280_v15 = vld [vmem:[#allocation5 + $0x9c] ss:$24 sps:$4 sm:$0xff]   ;;  %v2283_v17 = vld [vmem:[#allocation5 + $0x98] ss:$24 sps:$4 sm:$0xff]   ;;  %v2286_v19 = vld [vmem:[#allocation5 + $0xcc] ss:$24 sps:$4 sm:$0xff]  }
  0x70   : > { %934 = vmatpush1.bf16.msra.mxu0 %v2270_v8  ;;  %v2288_v20 = vld [vmem:[#allocation5 + $0xc0] ss:$24 sps:$4 sm:$0xff]   ;;  %v2290_v22 = vld [vmem:[#allocation5 + $0xf4] ss:$24 sps:$4 sm:$0xff]   ;;  %v2294_v24 = vld [vmem:[#allocation5 + $0xf0] ss:$24 sps:$4 sm:$0xff]  }
  0x71   : > { %975 = vmatpush1.bf16.msra.mxu1 %v2271_v9  ;;  %935 = vmatprep.subr.bf16.mxu0 %v2272_v10  ;;  %v2289_v21 = vld [vmem:[#allocation5 + $0xc8] ss:$24 sps:$4 sm:$0xff]   ;;  %v2292_v23 = vld [vmem:[#allocation5 + $0xfc] ss:$24 sps:$4 sm:$0xff]   ;;  %v2295_v25 = vld [vmem:[#allocation5 + $0xf8] ss:$24 sps:$4 sm:$0xff]  }
  0x72   : > { %976 = vmatprep.subr.bf16.mxu1 %v2274_v11  ;;  %v2296_v26 = vld [vmem:[#allocation5 + $0x124] ss:$24 sps:$4 sm:$0xff]   ;;  %v2300_v28 = vld [vmem:[#allocation5 + $0x120] ss:$24 sps:$4 sm:$0xff]   ;;  %v2302_v30 = vld [vmem:[#allocation5 + $0x154] ss:$24 sps:$4 sm:$0xff]  }
  0x73   : > { %v2298_v27 = vld [vmem:[#allocation5 + $0x12c] ss:$24 sps:$4 sm:$0xff]   ;;  %v2301_v29 = vld [vmem:[#allocation5 + $0x128] ss:$24 sps:$4 sm:$0xff]   ;;  %v2304_v31 = vld [vmem:[#allocation5 + $0x15c] ss:$24 sps:$4 sm:$0xff]  }
  0x74   : > { %936 = vmatpush1.bf16.msra.mxu0 %v2276_v12  ;;  %v2306_v32 = vld [vmem:[#allocation5 + $0x150] ss:$24 sps:$4 sm:$0xff]   ;;  %v2308_v34 = vld [vmem:[#allocation5 + $0x184] ss:$24 sps:$4 sm:$0xff]   ;;  %v2312_v36 = vld [vmem:[#allocation5 + $0x180] ss:$24 sps:$4 sm:$0xff]  }
  0x75   : > { %977 = vmatpush1.bf16.msra.mxu1 %v2277_v13  ;;  %937 = vmatprep.subr.bf16.mxu0 %v2278_v14  ;;  %v2307_v33 = vld [vmem:[#allocation5 + $0x158] ss:$24 sps:$4 sm:$0xff]   ;;  %v2310_v35 = vld [vmem:[#allocation5 + $0x18c] ss:$24 sps:$4 sm:$0xff]   ;;  %v2313_v37 = vld [vmem:[#allocation5 + $0x188] ss:$24 sps:$4 sm:$0xff]  }
  0x76   : > { %978 = vmatprep.subr.bf16.mxu1 %v2280_v15  ;;  %v2314_v38 = vld [vmem:[#allocation5 + $0x1b4] ss:$24 sps:$4 sm:$0xff]   ;;  %v2715_v40 = vmov 1966171168   ;;  %v2318_v43 = vld [vmem:[#allocation5 + $0x1b0] ss:$24 sps:$4 sm:$0xff]  }
  0x77   : > { %v2316_v39 = vld [vmem:[#allocation5 + $0x1bc] ss:$24 sps:$4 sm:$0xff]   ;;  %v436_v41 = vunpack.c.l.s4 %v2715_v40  ;;  %v2319_v44 = vld [vmem:[#allocation5 + $0x1b8] ss:$24 sps:$4 sm:$0xff]   ;;  %v2322_v46 = vld [vmem:[#allocation5 + $0x1ec] ss:$24 sps:$4 sm:$0xff]  }
  0x78   : > { %938 = vmatpush1.bf16.msra.mxu0 %v2282_v16  ;;  %v2320_v45 = vld [vmem:[#allocation5 + $0x1e4] ss:$24 sps:$4 sm:$0xff]   ;;  %v2904_v48 = vshrl.u32 %v438_v42, 7  ;;  %v2324_v49 = vld [vmem:[#allocation5 + $0x1e0] ss:$24 sps:$4 sm:$0xff]   ;;  %s2195_s22 = sshll.u32 %s2786_s13, 5 }
  0x79   : > { %979 = vmatpush1.bf16.msra.mxu1 %v2283_v17  ;;  %939 = vmatprep.subr.bf16.mxu0 %v2284_v18  ;;  %v437_v47 = vunpack.c.0.s8 %v436_v41  ;;  %v2325_v50 = vld [vmem:[#allocation5 + $0x1e8] ss:$24 sps:$4 sm:$0xff]   ;;  %v2326_v51 = vld [vmem:[#allocation5 + $0x214] ss:$24 sps:$4 sm:$0xff]   ;;  %v2331_v56 = vld [vmem:[#allocation5 + $0x218] ss:$24 sps:$4 sm:$0xff]   ;;  %s2975_s9 = scalar_lea.hbm %s3029_s8, %s2195_s22 }
  0x7a   : > { %980 = vmatprep.subr.bf16.mxu1 %v2286_v19  ;;  %v2328_v52 = vld [vmem:[#allocation5 + $0x21c] ss:$24 sps:$4 sm:$0xff]   ;;  %v2330_v55 = vld [vmem:[#allocation5 + $0x210] ss:$24 sps:$4 sm:$0xff]   ;;  %v2334_v59 = vld [vmem:[#allocation5 + $0x24c] ss:$24 sps:$4 sm:$0xff]  }
  0x7b   : > { %v2907_v53 = vsub.s32 %v437_v47, %v2904_v48  ;;  %v1993_v54 = vld.sshfl [vmem:[%s2895_s29] sm:$0x11 pattern:$0x75316420]  ;;  %v2336_v61 = vld [vmem:[#allocation5 + $0x240] ss:$24 sps:$4 sm:$0xff]  }
  0x7c   : > { %940 = vmatpush1.bf16.msra.mxu0 %v2288_v20  ;;  %v434_v57 = vcombine.high %v1993_v54, %v1993_v54  ;;  %v2332_v58 = vld [vmem:[#allocation5 + $0x244] ss:$24 sps:$4 sm:$0xff]   ;;  %v2337_v62 = vld [vmem:[#allocation5 + $0x248] ss:$24 sps:$4 sm:$0xff]   ;;  %v2338_v63 = vld [vmem:[#allocation5 + $0x274] ss:$24 sps:$4 sm:$0xff]  }
  0x7d   : > { %981 = vmatpush1.bf16.msra.mxu1 %v2289_v21  ;;  %941 = vmatprep.subr.bf16.mxu0 %v2290_v22  ;;  %v2340_v0 = vld [vmem:[#allocation5 + $0x27c] ss:$24 sps:$4 sm:$0xff]   ;;  %v2342_v1 = vld [vmem:[#allocation5 + $0x270] ss:$24 sps:$4 sm:$0xff]   ;;  %v2346_v4 = vld [vmem:[#allocation5 + $0x2ac] ss:$24 sps:$4 sm:$0xff]   ;;  %v2912_v13 = vrot.slane %v1993_v54, %v2907_v53 }
  0x7e   : > { %982 = vmatprep.subr.bf16.mxu1 %v2292_v23  ;;  %v448_v60 = vrot.slane %v434_v57, %v2907_v53  ;;  %v2343_v2 = vld [vmem:[#allocation5 + $0x278] ss:$24 sps:$4 sm:$0xff]   ;;  %v2344_v3 = vld [vmem:[#allocation5 + $0x2a4] ss:$24 sps:$4 sm:$0xff]   ;;  %v2349_v6 = vld [vmem:[#allocation5 + $0x2a8] ss:$24 sps:$4 sm:$0xff]  }
  0x7f   : > { %v2348_v5 = vld [vmem:[#allocation5 + $0x2a0] ss:$24 sps:$4 sm:$0xff]   ;;  %v2350_v7 = vld [vmem:[#allocation5 + $0x2d4] ss:$24 sps:$4 sm:$0xff]   ;;  %v2354_v9 = vld [vmem:[#allocation5 + $0x2d0] ss:$24 sps:$4 sm:$0xff]  }
  0x80   : > { %942 = vmatpush1.bf16.msra.mxu0 %v2294_v24  ;;  %963 = vmatprep.mubr.bf16.mxu0 %v448_v60  ;;  %v2352_v8 = vld [vmem:[#allocation5 + $0x2dc] ss:$24 sps:$4 sm:$0xff]   ;;  %v2355_v10 = vld [vmem:[#allocation5 + $0x2d8] ss:$24 sps:$4 sm:$0xff]   ;;  %s1901_s25 = sshll.u32 %s311_s30, 4  ;;  %vm1882_vm1 = vcmp.lt.s32.totalorder %v438_v42, 256  ;;  %s2977_s25 = int_to_ptr.vmem [resolvable:$true] %s1901_s25 }
  0x81   : > { %983 = vmatpush1.bf16.msra.mxu1 %v2295_v25  ;;  %943 = vmatprep.subr.bf16.mxu0 %v2296_v26  ;;  %v2358_v11 = vld [vmem:[#allocation5 + $0x14] ss:$24 sps:$4 sm:$0xff]   ;;  %v2361_v12 = vld [vmem:[#allocation8 + $0x4] ss:$24 sps:$4 sm:$0xff]   ;;  %v2356_v14 = vld [vmem:[#allocation5 + $0x10] ss:$24 sps:$4 sm:$0xff]  }
  0x82   : > { %984 = vmatprep.subr.bf16.mxu1 %v2298_v27  ;;  %1004 = vmatprep.mubr.bf16.mxu1 %v448_v60  ;;  %v2359_v15 = vld [vmem:[#allocation8] ss:$24 sps:$4 sm:$0xff]   ;;  %v2364_v16 = vld [vmem:[#allocation5 + $0x44] ss:$24 sps:$4 sm:$0xff]   ;;  %v2367_v17 = vld [vmem:[#allocation8 + $0x34] ss:$24 sps:$4 sm:$0xff]  }
  0x83   : > { %v2362_v18 = vld [vmem:[#allocation5 + $0x40] ss:$24 sps:$4 sm:$0xff]   ;;  %v2365_v19 = vld [vmem:[#allocation8 + $0x30] ss:$24 sps:$4 sm:$0xff]   ;;  %v2370_v20 = vld [vmem:[#allocation5 + $0x74] ss:$24 sps:$4 sm:$0xff]  }
  0x84   : > { %944 = vmatpush1.bf16.msra.mxu0 %v2300_v28  ;;  %v2373_v21 = vld [vmem:[#allocation8 + $0x64] ss:$24 sps:$4 sm:$0xff]   ;;  %v2368_v22 = vld [vmem:[#allocation5 + $0x70] ss:$24 sps:$4 sm:$0xff]   ;;  %v2371_v23 = vld [vmem:[#allocation8 + $0x60] ss:$24 sps:$4 sm:$0xff]  }
  0x85   : > { %985 = vmatpush1.bf16.msra.mxu1 %v2301_v29  ;;  %945 = vmatprep.subr.bf16.mxu0 %v2302_v30  ;;  %v2376_v24 = vld [vmem:[#allocation5 + $0xa4] ss:$24 sps:$4 sm:$0xff]   ;;  %v2379_v25 = vld [vmem:[#allocation8 + $0x94] ss:$24 sps:$4 sm:$0xff]   ;;  %v2374_v26 = vld [vmem:[#allocation5 + $0xa0] ss:$24 sps:$4 sm:$0xff]  }
  0x86   : > { %986 = vmatprep.subr.bf16.mxu1 %v2304_v31  ;;  %v2377_v27 = vld [vmem:[#allocation8 + $0x90] ss:$24 sps:$4 sm:$0xff]   ;;  %v2382_v28 = vld [vmem:[#allocation5 + $0xd4] ss:$24 sps:$4 sm:$0xff]   ;;  %v2385_v29 = vld [vmem:[#allocation8 + $0xc4] ss:$24 sps:$4 sm:$0xff]  }
  0x87   : > { %v2380_v30 = vld [vmem:[#allocation5 + $0xd0] ss:$24 sps:$4 sm:$0xff]   ;;  %v2383_v31 = vld [vmem:[#allocation8 + $0xc0] ss:$24 sps:$4 sm:$0xff]   ;;  %s1887_s13 = scalar_lea.sflag [#allocation7], %s309_s24  ;;  %s2636_s14 = scalar_lea.vmem %s2977_s25, 32 }
  0x88   : > { %946 = vmatpush1.bf16.msra.mxu0 %v2306_v32  ;;  %v2388_v32 = vld [vmem:[#allocation5 + $0x104] ss:$24 sps:$4 sm:$0xff]   ;;  %v2392_v41 = vld [vmem:[#allocation5 + $0x130] ss:$24 sps:$4 sm:$0xff]   ;;  %v2398_v47 = vld [vmem:[#allocation5 + $0x160] ss:$24 sps:$4 sm:$0xff]   ;;  %p2637_p2 = scmp.ne.s32.totalorder %s2977_s25, %s2636_s14 }
  0x89   : > { %987 = vmatpush1.bf16.msra.mxu1 %v2307_v33  ;;  %947 = vmatprep.subr.bf16.mxu0 %v2308_v34  ;;  %v2391_v33 = vld [vmem:[#allocation8 + $0xf4] ss:$24 sps:$4 sm:$0xff]   ;;  %v2917_v34 = vsub.s32 1, %v2904_v48  ;;  %v2407_v54 = vld [vmem:[#allocation8 + $0x180] ss:$24 sps:$4 sm:$0xff]   ;;  %p3044_p7 = scmp.ne.s32.totalorder %s3034_s19, 0 }
  0x8a   : > { %988 = vmatprep.subr.bf16.mxu1 %v2310_v35  ;;  %v2386_v35 = vld [vmem:[#allocation5 + $0x100] ss:$24 sps:$4 sm:$0xff]   ;;  %s2716_s16 = smov [#allocation10]  }
  0x8b   : > { %v2410_v57 = vld [vmem:[#allocation5 + $0x1c0] ss:$24 sps:$4 sm:$0xff]   ;;  %p2638_p8 = pnand %p2637_p2, %p3044_p7  ;;  %s2640_s17 = sshll.u32 %s2716_s16, 4  ;;  %s2641_s17 = int_to_ptr.vmem [resolvable:$false] %s2640_s17 }
  0x8c   : > { %948 = vmatpush1.bf16.msra.mxu0 %v2312_v36  ;;  %v2389_v36 = vld [vmem:[#allocation8 + $0xf0] ss:$24 sps:$4 sm:$0xff]   ;;  %s2642_s23 = scalar_lea.vmem %s2641_s17, 64  ;;  %p2643_p12 = scmp.lt.s32.totalorder %s2977_s25, %s2641_s17 }
  0x8d   : > { %989 = vmatpush1.bf16.msra.mxu1 %v2313_v37  ;;  %949 = vmatprep.subr.bf16.mxu0 %v2314_v38  ;;  %v2394_v37 = vld [vmem:[#allocation5 + $0x134] ss:$24 sps:$4 sm:$0xff]   ;;  %v2397_v38 = vld [vmem:[#allocation8 + $0x124] ss:$24 sps:$4 sm:$0xff]   ;;  %p2639_p9 = pneg %p2638_p8  ;;  %p2644_p13 = scmp.lt.s32.totalorder %s2642_s23, %s2636_s14 }
  0x8e   : > { %990 = vmatprep.subr.bf16.mxu1 %v2316_v39  ;;  %v2919_v39 = vld [vmem:[#allocation2] sm:$0x3] }
  0x8f   : > { %v2923_v40 = vrot.slane %v2919_v39, %v2917_v34  ;;  %p2645_p3 = por %p2644_p13, %p2643_p12 }
  0x90   : > { %950 = vmatpush1.bf16.msra.mxu0 %v2318_v43  ;;  %v2395_v43 = vld [vmem:[#allocation8 + $0x120] ss:$24 sps:$4 sm:$0xff]  }
  0x91   : > { %991 = vmatpush1.bf16.msra.mxu1 %v2319_v44  ;;  %951 = vmatprep.subr.bf16.mxu0 %v2320_v45  ;;  %v2927_v44 = vpack.c.bf16 %v2923_v40, %v2923_v40  ;;  %v2400_v45 = vld [vmem:[#allocation5 + $0x164] ss:$24 sps:$4 sm:$0xff]   ;;  %p2646_p5 = pnand %p2645_p3, %p2639_p9 }
  0x92   : > { %992 = vmatprep.subr.bf16.mxu1 %v2322_v46  ;;  %v2403_v46 = vld [vmem:[#allocation8 + $0x154] ss:$24 sps:$4 sm:$0xff]  }
  0x94   : > { %952 = vmatpush1.bf16.msra.mxu0 %v2324_v49  ;;  %v2401_v49 = vld [vmem:[#allocation8 + $0x150] ss:$24 sps:$4 sm:$0xff]  }
  0x95   : > { %993 = vmatpush1.bf16.msra.mxu1 %v2325_v50  ;;  %953 = vmatprep.subr.bf16.mxu0 %v2326_v51  ;;  %v2406_v50 = vld [vmem:[#allocation5 + $0x194] ss:$24 sps:$4 sm:$0xff]   ;;  %v2409_v51 = vld [vmem:[#allocation8 + $0x184] ss:$24 sps:$4 sm:$0xff]  }
  0x96   : > { %994 = vmatprep.subr.bf16.mxu1 %v2328_v52  ;;  %v2404_v52 = vld [vmem:[#allocation5 + $0x190] ss:$24 sps:$4 sm:$0xff]  }
  0x98   : > { %954 = vmatpush1.bf16.msra.mxu0 %v2330_v55  ;;  %v2412_v55 = vld [vmem:[#allocation5 + $0x1c4] ss:$24 sps:$4 sm:$0xff]  }
  0x99   : > { %995 = vmatpush1.bf16.msra.mxu1 %v2331_v56  ;;  %955 = vmatprep.subr.bf16.mxu0 %v2332_v58  ;;  %v2415_v56 = vld [vmem:[#allocation8 + $0x1b4] ss:$24 sps:$4 sm:$0xff]   ;;  %v2413_v58 = vld [vmem:[#allocation8 + $0x1b0] ss:$24 sps:$4 sm:$0xff]  }
  0x9a   : > { %996 = vmatprep.subr.bf16.mxu1 %v2334_v59  ;;  %v2418_v59 = vld [vmem:[#allocation5 + $0x1f4] ss:$24 sps:$4 sm:$0xff]  }
  0x9c   : > { %956 = vmatpush1.bf16.msra.mxu0 %v2336_v61  ;;  %v2416_v61 = vld [vmem:[#allocation5 + $0x1f0] ss:$24 sps:$4 sm:$0xff]  }
  0x9d   : > { %997 = vmatpush1.bf16.msra.mxu1 %v2337_v62  ;;  %957 = vmatprep.subr.bf16.mxu0 %v2338_v63  ;;  %v2419_v62 = vld [vmem:[#allocation8 + $0x1e0] ss:$24 sps:$4 sm:$0xff]   ;;  %v2424_v63 = vld [vmem:[#allocation5 + $0x224] ss:$24 sps:$4 sm:$0xff]  }
  0x9e   : > { %998 = vmatprep.subr.bf16.mxu1 %v2340_v0  ;;  %v2427_v0 = vld [vmem:[#allocation8 + $0x214] ss:$24 sps:$4 sm:$0xff]  }
  0xa0   : > { %958 = vmatpush1.bf16.msra.mxu0 %v2342_v1  ;;  %v2422_v1 = vld [vmem:[#allocation5 + $0x220] ss:$24 sps:$4 sm:$0xff]  }
  0xa1   : > { %999 = vmatpush1.bf16.msra.mxu1 %v2343_v2  ;;  %959 = vmatprep.subr.bf16.mxu0 %v2344_v3  ;;  %v2425_v2 = vld [vmem:[#allocation8 + $0x210] ss:$24 sps:$4 sm:$0xff]   ;;  %v2430_v3 = vld [vmem:[#allocation5 + $0x254] ss:$24 sps:$4 sm:$0xff]  }
  0xa2   : > { %1000 = vmatprep.subr.bf16.mxu1 %v2346_v4  ;;  %v2433_v4 = vld [vmem:[#allocation8 + $0x244] ss:$24 sps:$4 sm:$0xff]  }
  0xa4   : > { %960 = vmatpush1.bf16.msra.mxu0 %v2348_v5  ;;  %v2428_v5 = vld [vmem:[#allocation5 + $0x250] ss:$24 sps:$4 sm:$0xff]  }
  0xa5   : > { %1001 = vmatpush1.bf16.msra.mxu1 %v2349_v6  ;;  %961 = vmatprep.subr.bf16.mxu0 %v2350_v7  ;;  %v2431_v6 = vld [vmem:[#allocation8 + $0x240] ss:$24 sps:$4 sm:$0xff]   ;;  %v2436_v7 = vld [vmem:[#allocation5 + $0x284] ss:$24 sps:$4 sm:$0xff]  }
  0xa6   : > { %1002 = vmatprep.subr.bf16.mxu1 %v2352_v8  ;;  %v2439_v8 = vld [vmem:[#allocation8 + $0x274] ss:$24 sps:$4 sm:$0xff]  }
  0xa8   : > { %962 = vmatpush1.bf16.msra.mxu0 %v2354_v9  ;;  %v2434_v9 = vld [vmem:[#allocation5 + $0x280] ss:$24 sps:$4 sm:$0xff]  }
  0xa9   : > { %1003 = vmatpush1.bf16.msra.mxu1 %v2355_v10  ;;  %1013 = vmatprep.subr.bf16.mxu0 %v2358_v11  ;;  %v2437_v10 = vld [vmem:[#allocation8 + $0x270] ss:$24 sps:$4 sm:$0xff]   ;;  %v2442_v11 = vld [vmem:[#allocation5 + $0x2b4] ss:$24 sps:$4 sm:$0xff]  }
  0xaa   : > { %1643 = vmatprep.subr.bf16.mxu1 %v2361_v12  ;;  %v2445_v12 = vld [vmem:[#allocation8 + $0x2a4] ss:$24 sps:$4 sm:$0xff]  }
  0xab   : > { %964 = vmatmul.mubr.bf16.vlgmr.msra.gmra.mrb[0].mxu0 %v2912_v13 }
  0xac   : > { %1005 = vmatmul.mubr.bf16.vlgmr.msra.gmra.mrb[0].mxu1 %v2912_v13  ;;  %1014 = vmatpush1.bf16.msra.mxu0 %v2356_v14  ;;  %v2931_v14 = vsub.s32 0, %v2904_v48 }
  0xad   : > { %1644 = vmatpush1.bf16.msra.mxu1 %v2359_v15  ;;  %1015 = vmatprep.subr.bf16.mxu0 %v2364_v16  ;;  %v2440_v15 = vld [vmem:[#allocation5 + $0x2b0] ss:$24 sps:$4 sm:$0xff]   ;;  %v2443_v16 = vld [vmem:[#allocation8 + $0x2a0] ss:$24 sps:$4 sm:$0xff]  }
  0xae   : > { %1645 = vmatprep.subr.bf16.mxu1 %v2367_v17  ;;  %1045 = vmatprep.mubr.bf16.mxu0 %v448_v60  ;;  %v2421_v60 = vld [vmem:[#allocation8 + $0x1e4] ss:$24 sps:$4 sm:$0xff]  }
  0xaf   : > { %1675 = vmatprep.mubr.bf16.mxu1 %v2927_v44  ;;  %v2448_v17 = vld [vmem:[#allocation5 + $0x2e4] ss:$24 sps:$4 sm:$0xff]  }
  0xb0   : > { %1016 = vmatpush1.bf16.msra.mxu0 %v2362_v18  ;;  %v2451_v18 = vld [vmem:[#allocation8 + $0x2d4] ss:$24 sps:$4 sm:$0xff]  }
  0xb1   : > { %1646 = vmatpush1.bf16.msra.mxu1 %v2365_v19  ;;  %1017 = vmatprep.subr.bf16.mxu0 %v2370_v20  ;;  %v2935_v19 = vrot.slane %v2919_v39, %v2931_v14  ;;  %v2446_v20 = vld [vmem:[#allocation5 + $0x2e0] ss:$24 sps:$4 sm:$0xff]   ;;  %v2478_v39 = vld [vmem:[#allocation8 + $0xcc] ss:$24 sps:$4 sm:$0xff]  }
  0xb2   : > { %1647 = vmatprep.subr.bf16.mxu1 %v2373_v21  ;;  %v2449_v21 = vld [vmem:[#allocation8 + $0x2d0] ss:$24 sps:$4 sm:$0xff]  }
  0xb4   : > { %1018 = vmatpush1.bf16.msra.mxu0 %v2368_v22  ;;  %v2454_v22 = vld [vmem:[#allocation8 + $0xc] ss:$24 sps:$4 sm:$0xff]  }
  0xb5   : > { %1648 = vmatpush1.bf16.msra.mxu1 %v2371_v23  ;;  %1019 = vmatprep.subr.bf16.mxu0 %v2376_v24  ;;  %v2457_v23 = vld [vmem:[#allocation8 + $0x14] ss:$24 sps:$4 sm:$0xff]   ;;  %v2939_v24 = vpack.c.bf16 %v2935_v19, %v2935_v19 }
  0xb6   : > { %1649 = vmatprep.subr.bf16.mxu1 %v2379_v25  ;;  %v2452_v25 = vld [vmem:[#allocation8 + $0x8] ss:$24 sps:$4 sm:$0xff]  }
  0xb8   : > { %1020 = vmatpush1.bf16.msra.mxu0 %v2374_v26  ;;  %v2455_v26 = vld [vmem:[#allocation8 + $0x10] ss:$24 sps:$4 sm:$0xff]  }
  0xb9   : > { %1650 = vmatpush1.bf16.msra.mxu1 %v2377_v27  ;;  %1021 = vmatprep.subr.bf16.mxu0 %v2382_v28  ;;  %v2460_v27 = vld [vmem:[#allocation8 + $0x3c] ss:$24 sps:$4 sm:$0xff]  }
  0xba   : > { %1651 = vmatprep.subr.bf16.mxu1 %v2385_v29  ;;  %v2463_v28 = vld [vmem:[#allocation8 + $0x44] ss:$24 sps:$4 sm:$0xff]   ;;  %v2458_v29 = vld [vmem:[#allocation8 + $0x38] ss:$24 sps:$4 sm:$0xff]  }
  0xbc   : > { %1022 = vmatpush1.bf16.msra.mxu0 %v2380_v30  ;;  %v2461_v30 = vld [vmem:[#allocation8 + $0x40] ss:$24 sps:$4 sm:$0xff]  }
  0xbd   : > { %1652 = vmatpush1.bf16.msra.mxu1 %v2383_v31  ;;  %1023 = vmatprep.subr.bf16.mxu0 %v2388_v32  ;;  %v2466_v31 = vld [vmem:[#allocation8 + $0x6c] ss:$24 sps:$4 sm:$0xff]  }
  0xbe   : > { %1653 = vmatprep.subr.bf16.mxu1 %v2391_v33  ;;  %v2469_v32 = vld [vmem:[#allocation8 + $0x74] ss:$24 sps:$4 sm:$0xff]   ;;  %v2464_v33 = vld [vmem:[#allocation8 + $0x68] ss:$24 sps:$4 sm:$0xff]  }
  0xc0   : > { %1024 = vmatpush1.bf16.msra.mxu0 %v2386_v35  ;;  %v2467_v35 = vld [vmem:[#allocation8 + $0x70] ss:$24 sps:$4 sm:$0xff]  }
  0xc1   : > { %1654 = vmatpush1.bf16.msra.mxu1 %v2389_v36  ;;  %1025 = vmatprep.subr.bf16.mxu0 %v2394_v37  ;;  %v2475_v36 = vld [vmem:[#allocation8 + $0xa4] ss:$24 sps:$4 sm:$0xff]   ;;  %v2470_v37 = vld [vmem:[#allocation8 + $0x98] ss:$24 sps:$4 sm:$0xff]  }
  0xc2   : > { %1655 = vmatprep.subr.bf16.mxu1 %v2397_v38  ;;  %v2473_v38 = vld [vmem:[#allocation8 + $0xa0] ss:$24 sps:$4 sm:$0xff]  }
  0xc4   : > { %1026 = vmatpush1.bf16.msra.mxu0 %v2392_v41  ;;  %v2481_v41 = vld [vmem:[#allocation8 + $0xd4] ss:$24 sps:$4 sm:$0xff]  }
  0xc5   : > { %1656 = vmatpush1.bf16.msra.mxu1 %v2395_v43  ;;  %1027 = vmatprep.subr.bf16.mxu0 %v2400_v45  ;;  %v2476_v43 = vld [vmem:[#allocation8 + $0xc8] ss:$24 sps:$4 sm:$0xff]   ;;  %v2484_v45 = vld [vmem:[#allocation8 + $0xfc] ss:$24 sps:$4 sm:$0xff]  }
  0xc6   : > { %1657 = vmatprep.subr.bf16.mxu1 %v2403_v46  ;;  %v2487_v46 = vld [vmem:[#allocation8 + $0x104] ss:$24 sps:$4 sm:$0xff]  }
  0xc8   : > { %1028 = vmatpush1.bf16.msra.mxu0 %v2398_v47  ;;  %v2482_v47 = vld [vmem:[#allocation8 + $0xf8] ss:$24 sps:$4 sm:$0xff]  }
  0xc9   : > { %1658 = vmatpush1.bf16.msra.mxu1 %v2401_v49  ;;  %1029 = vmatprep.subr.bf16.mxu0 %v2406_v50  ;;  %v2485_v49 = vld [vmem:[#allocation8 + $0x100] ss:$24 sps:$4 sm:$0xff]   ;;  %v2490_v50 = vld [vmem:[#allocation8 + $0x12c] ss:$24 sps:$4 sm:$0xff]  }
  0xca   : > { %1659 = vmatprep.subr.bf16.mxu1 %v2409_v51  ;;  %v2493_v51 = vld [vmem:[#allocation8 + $0x134] ss:$24 sps:$4 sm:$0xff]  }
  0xcc   : > { %1030 = vmatpush1.bf16.msra.mxu0 %v2404_v52  ;;  %v2488_v52 = vld [vmem:[#allocation8 + $0x128] ss:$24 sps:$4 sm:$0xff]  }
  0xcd   : > { %1660 = vmatpush1.bf16.msra.mxu1 %v2407_v54  ;;  %1031 = vmatprep.subr.bf16.mxu0 %v2412_v55  ;;  %v2491_v54 = vld [vmem:[#allocation8 + $0x130] ss:$24 sps:$4 sm:$0xff]   ;;  %v2496_v55 = vld [vmem:[#allocation8 + $0x15c] ss:$24 sps:$4 sm:$0xff]  }
  0xce   : > { %1661 = vmatprep.subr.bf16.mxu1 %v2415_v56  ;;  %v2499_v56 = vld [vmem:[#allocation8 + $0x164] ss:$24 sps:$4 sm:$0xff]  }
  0xd0   : > { %1032 = vmatpush1.bf16.msra.mxu0 %v2410_v57  ;;  %v2494_v57 = vld [vmem:[#allocation8 + $0x158] ss:$24 sps:$4 sm:$0xff]  }
  0xd1   : > { %1662 = vmatpush1.bf16.msra.mxu1 %v2413_v58  ;;  %1033 = vmatprep.subr.bf16.mxu0 %v2418_v59  ;;  %v2497_v58 = vld [vmem:[#allocation8 + $0x160] ss:$24 sps:$4 sm:$0xff]   ;;  %v2502_v59 = vld [vmem:[#allocation8 + $0x18c] ss:$24 sps:$4 sm:$0xff]  }
  0xd2   : > { %1663 = vmatprep.subr.bf16.mxu1 %v2421_v60  ;;  %v2505_v60 = vld [vmem:[#allocation8 + $0x194] ss:$24 sps:$4 sm:$0xff]  }
  0xd4   : > { %1034 = vmatpush1.bf16.msra.mxu0 %v2416_v61  ;;  %v2500_v61 = vld [vmem:[#allocation8 + $0x188] ss:$24 sps:$4 sm:$0xff]  }
  0xd5   : > { %1664 = vmatpush1.bf16.msra.mxu1 %v2419_v62  ;;  %1035 = vmatprep.subr.bf16.mxu0 %v2424_v63  ;;  %v2503_v62 = vld [vmem:[#allocation8 + $0x190] ss:$24 sps:$4 sm:$0xff]   ;;  %v2508_v63 = vld [vmem:[#allocation8 + $0x1bc] ss:$24 sps:$4 sm:$0xff]  }
  0xd6   : > { %1665 = vmatprep.subr.bf16.mxu1 %v2427_v0  ;;  %v2511_v0 = vld [vmem:[#allocation8 + $0x1c4] ss:$24 sps:$4 sm:$0xff]  }
  0xd8   : > { %1036 = vmatpush1.bf16.msra.mxu0 %v2422_v1  ;;  %v2506_v1 = vld [vmem:[#allocation8 + $0x1b8] ss:$24 sps:$4 sm:$0xff]  }
  0xd9   : > { %1666 = vmatpush1.bf16.msra.mxu1 %v2425_v2  ;;  %1037 = vmatprep.subr.bf16.mxu0 %v2430_v3  ;;  %v2509_v2 = vld [vmem:[#allocation8 + $0x1c0] ss:$24 sps:$4 sm:$0xff]   ;;  %v2514_v3 = vld [vmem:[#allocation8 + $0x1ec] ss:$24 sps:$4 sm:$0xff]  }
  0xda   : > { %1667 = vmatprep.subr.bf16.mxu1 %v2433_v4  ;;  %v2517_v4 = vld [vmem:[#allocation8 + $0x1f4] ss:$24 sps:$4 sm:$0xff]  }
  0xdc   : > { %1038 = vmatpush1.bf16.msra.mxu0 %v2428_v5  ;;  %v2512_v5 = vld [vmem:[#allocation8 + $0x1e8] ss:$24 sps:$4 sm:$0xff]  }
  0xdd   : > { %1668 = vmatpush1.bf16.msra.mxu1 %v2431_v6  ;;  %1039 = vmatprep.subr.bf16.mxu0 %v2436_v7  ;;  %v2515_v6 = vld [vmem:[#allocation8 + $0x1f0] ss:$24 sps:$4 sm:$0xff]   ;;  %v2520_v7 = vld [vmem:[#allocation8 + $0x21c] ss:$24 sps:$4 sm:$0xff]  }
  0xde   : > { %1669 = vmatprep.subr.bf16.mxu1 %v2439_v8  ;;  %v2523_v8 = vld [vmem:[#allocation8 + $0x224] ss:$24 sps:$4 sm:$0xff]  }
  0xe0   : > { %1040 = vmatpush1.bf16.msra.mxu0 %v2434_v9  ;;  %v2518_v9 = vld [vmem:[#allocation8 + $0x218] ss:$24 sps:$4 sm:$0xff]  }
  0xe1   : > { %1670 = vmatpush1.bf16.msra.mxu1 %v2437_v10  ;;  %1041 = vmatprep.subr.bf16.mxu0 %v2442_v11  ;;  %v2521_v10 = vld [vmem:[#allocation8 + $0x220] ss:$24 sps:$4 sm:$0xff]   ;;  %v2526_v11 = vld [vmem:[#allocation8 + $0x24c] ss:$24 sps:$4 sm:$0xff]  }
  0xe2   : > { %1671 = vmatprep.subr.bf16.mxu1 %v2445_v12  ;;  %v2529_v12 = vld [vmem:[#allocation8 + $0x254] ss:$24 sps:$4 sm:$0xff]  }
  0xe4   : > { %1042 = vmatpush1.bf16.msra.mxu0 %v2440_v15  ;;  %v2524_v15 = vld [vmem:[#allocation8 + $0x248] ss:$24 sps:$4 sm:$0xff]  }
  0xe5   : > { %1672 = vmatpush1.bf16.msra.mxu1 %v2443_v16  ;;  %1043 = vmatprep.subr.bf16.mxu0 %v2448_v17  ;;  %v2527_v16 = vld [vmem:[#allocation8 + $0x250] ss:$24 sps:$4 sm:$0xff]   ;;  %v2532_v17 = vld [vmem:[#allocation8 + $0x27c] ss:$24 sps:$4 sm:$0xff]  }
  0xe6   : > { %1673 = vmatprep.subr.bf16.mxu1 %v2451_v18  ;;  %v2535_v18 = vld [vmem:[#allocation8 + $0x284] ss:$24 sps:$4 sm:$0xff]  }
  0xe8   : > { %1044 = vmatpush1.bf16.msra.mxu0 %v2446_v20  ;;  %v2530_v20 = vld [vmem:[#allocation8 + $0x278] ss:$24 sps:$4 sm:$0xff]  }
  0xe9   : > { %1674 = vmatpush1.bf16.msra.mxu1 %v2449_v21  ;;  %1684 = vmatprep.subr.bf16.mxu0 %v2454_v22  ;;  %v2533_v21 = vld [vmem:[#allocation8 + $0x280] ss:$24 sps:$4 sm:$0xff]   ;;  %v2538_v22 = vld [vmem:[#allocation8 + $0x2ac] ss:$24 sps:$4 sm:$0xff]  }
  0xea   : > { %1725 = vmatprep.subr.bf16.mxu1 %v2457_v23  ;;  %v2541_v23 = vld [vmem:[#allocation8 + $0x2b4] ss:$24 sps:$4 sm:$0xff]  }
  0xeb   : > { %1046 = vmatmul.mubr.bf16.vlgmr.msra.gmra.mrb[4].mxu0 %v2912_v13  ;;  %v2472_v13 = vld [vmem:[#allocation8 + $0x9c] ss:$24 sps:$4 sm:$0xff]  }
  0xec   : > { %1676 = vmatmul.mubr.bf16.vlgmr.msra.gmra.mrb[4].mxu1 %v2939_v24  ;;  %1685 = vmatpush1.bf16.msra.mxu0 %v2452_v25  ;;  %v2536_v25 = vld [vmem:[#allocation8 + $0x2a8] ss:$24 sps:$4 sm:$0xff]  }
  0xed   : > { %1726 = vmatpush1.bf16.msra.mxu1 %v2455_v26  ;;  %1686 = vmatprep.subr.bf16.mxu0 %v2460_v27  ;;  %v2539_v26 = vld [vmem:[#allocation8 + $0x2b0] ss:$24 sps:$4 sm:$0xff]   ;;  %v2544_v27 = vld [vmem:[#allocation8 + $0x2dc] ss:$24 sps:$4 sm:$0xff]  }
  0xee   : > { %1727 = vmatprep.subr.bf16.mxu1 %v2463_v28  ;;  %1716 = vmatprep.mubr.bf16.mxu0 %v2927_v44  ;;  %v2547_v28 = vld [vmem:[#allocation8 + $0x2e4] ss:$24 sps:$4 sm:$0xff]  }
  0xef   : > { %1757 = vmatprep.mubr.bf16.mxu1 %v2927_v44  ;;  %v2479_v44 = vld [vmem:[#allocation8 + $0xd0] ss:$24 sps:$4 sm:$0xff]  }
  0xf0   : > { %1687 = vmatpush1.bf16.msra.mxu0 %v2458_v29  ;;  %v2542_v29 = vld [vmem:[#allocation8 + $0x2d8] ss:$24 sps:$4 sm:$0xff]  }
  0xf1   : > { %1728 = vmatpush1.bf16.msra.mxu1 %v2461_v30  ;;  %1688 = vmatprep.subr.bf16.mxu0 %v2466_v31  ;;  %v2545_v30 = vld [vmem:[#allocation8 + $0x2e0] ss:$24 sps:$4 sm:$0xff]  }
  0xf2   : > { %1729 = vmatprep.subr.bf16.mxu1 %v2469_v32 }
  0xf4   : > { %1689 = vmatpush1.bf16.msra.mxu0 %v2464_v33 }
  0xf5   : > { %1730 = vmatpush1.bf16.msra.mxu1 %v2467_v35  ;;  %1690 = vmatprep.subr.bf16.mxu0 %v2472_v13 }
  0xf6   : > { %1731 = vmatprep.subr.bf16.mxu1 %v2475_v36 }
  0xf8   : > { %1691 = vmatpush1.bf16.msra.mxu0 %v2470_v37 }
  0xf9   : > { %1732 = vmatpush1.bf16.msra.mxu1 %v2473_v38  ;;  %1692 = vmatprep.subr.bf16.mxu0 %v2478_v39 }
  0xfa   : > { %1733 = vmatprep.subr.bf16.mxu1 %v2481_v41 }
  0xfc   : > { %1693 = vmatpush1.bf16.msra.mxu0 %v2476_v43 }
  0xfd   : > { %1734 = vmatpush1.bf16.msra.mxu1 %v2479_v44  ;;  %1694 = vmatprep.subr.bf16.mxu0 %v2484_v45 }
  0xfe   : > { %1735 = vmatprep.subr.bf16.mxu1 %v2487_v46 }
 0x100   : > { %1695 = vmatpush1.bf16.msra.mxu0 %v2482_v47 }
 0x101   : > { %1736 = vmatpush1.bf16.msra.mxu1 %v2485_v49  ;;  %1696 = vmatprep.subr.bf16.mxu0 %v2490_v50 }
 0x102   : > { %1737 = vmatprep.subr.bf16.mxu1 %v2493_v51 }
 0x104   : > { %1697 = vmatpush1.bf16.msra.mxu0 %v2488_v52 }
 0x105   : > { %1738 = vmatpush1.bf16.msra.mxu1 %v2491_v54  ;;  %1698 = vmatprep.subr.bf16.mxu0 %v2496_v55 }
 0x106   : > { %1739 = vmatprep.subr.bf16.mxu1 %v2499_v56 }
 0x108   : > { %1699 = vmatpush1.bf16.msra.mxu0 %v2494_v57 }
 0x109   : > { %1740 = vmatpush1.bf16.msra.mxu1 %v2497_v58  ;;  %1700 = vmatprep.subr.bf16.mxu0 %v2502_v59 }
 0x10a   : > { %1741 = vmatprep.subr.bf16.mxu1 %v2505_v60 }
 0x10c   : > { %1701 = vmatpush1.bf16.msra.mxu0 %v2500_v61 }
 0x10d   : > { %1742 = vmatpush1.bf16.msra.mxu1 %v2503_v62  ;;  %1702 = vmatprep.subr.bf16.mxu0 %v2508_v63  ;;  %v1834_v63 = vld [vmem:[%s3028_s7] sm:$0x3] }
 0x10e   : > { %1743 = vmatprep.subr.bf16.mxu1 %v2511_v0  ;;  %v1782_v0 = vsub.s32 2, %v2904_v48 }
 0x110   : > { %1703 = vmatpush1.bf16.msra.mxu0 %v2506_v1  ;;  %v1820_v1 = vld [vmem:[%s3027_s6] sm:$0x3] }
 0x111   : > { %1744 = vmatpush1.bf16.msra.mxu1 %v2509_v2  ;;  %1704 = vmatprep.subr.bf16.mxu0 %v2514_v3  ;;  %v1786_v2 = vsub.s32 3, %v2904_v48  ;;  %v1839_v3 = vrot.slane %v1834_v63, %v2931_v14 }
 0x112   : > { %1745 = vmatprep.subr.bf16.mxu1 %v2517_v4  ;;  %v1843_v4 = vrot.slane %v1834_v63, %v2917_v34 }
 0x114   : > { %1705 = vmatpush1.bf16.msra.mxu0 %v2512_v5  ;;  %v1825_v5 = vrot.slane %v1820_v1, %v2931_v14 }
 0x115   : > { %1746 = vmatpush1.bf16.msra.mxu1 %v2515_v6  ;;  %1706 = vmatprep.subr.bf16.mxu0 %v2520_v7  ;;  %v1829_v7 = vrot.slane %v1820_v1, %v2917_v34 }
 0x116   : > { %1747 = vmatprep.subr.bf16.mxu1 %v2523_v8 }
 0x118   : > { %1707 = vmatpush1.bf16.msra.mxu0 %v2518_v9 }
 0x119   : > { %1748 = vmatpush1.bf16.msra.mxu1 %v2521_v10  ;;  %1708 = vmatprep.subr.bf16.mxu0 %v2526_v11 }
 0x11a   : > { %1749 = vmatprep.subr.bf16.mxu1 %v2529_v12 }
 0x11c   : > { %1709 = vmatpush1.bf16.msra.mxu0 %v2524_v15 }
 0x11d   : > { %1750 = vmatpush1.bf16.msra.mxu1 %v2527_v16  ;;  %1710 = vmatprep.subr.bf16.mxu0 %v2532_v17 }
 0x11e   : > { %1751 = vmatprep.subr.bf16.mxu1 %v2535_v18 }
 0x120   : > { %1711 = vmatpush1.bf16.msra.mxu0 %v2530_v20 }
 0x121   : > { %1752 = vmatpush1.bf16.msra.mxu1 %v2533_v21  ;;  %1712 = vmatprep.subr.bf16.mxu0 %v2538_v22 }
 0x122   : > { %1753 = vmatprep.subr.bf16.mxu1 %v2541_v23 }
 0x124   : > { %1713 = vmatpush1.bf16.msra.mxu0 %v2536_v25 }
 0x125   : > { %1754 = vmatpush1.bf16.msra.mxu1 %v2539_v26  ;;  %1714 = vmatprep.subr.bf16.mxu0 %v2544_v27 }
 0x126   : > { %1755 = vmatprep.subr.bf16.mxu1 %v2547_v28 }
 0x128   : > { %1715 = vmatpush1.bf16.msra.mxu0 %v2542_v29 }
 0x129   : > { %1756 = vmatpush1.bf16.msra.mxu1 %v2545_v30 }
 0x12b   : > { %1717 = vmatmul.mubr.bf16.vlgmr.msra.gmra.mrb[8].mxu0 %v2939_v24 }
 0x12c   : > { %1758 = vmatmul.mubr.bf16.vlgmr.msra.gmra.mrb[8].mxu1 %v2939_v24  ;;  %v1770_v24 = vld [vmem:[%s3026_s5] sm:$0xf] }
 0x12d   : > { %v1775_v52 = vrot.slane %v1770_v24, %v2931_v14  ;;  %v1779_v54 = vrot.slane %v1770_v24, %v2917_v34  ;;  %v1783_v6 = vrot.slane %v1770_v24, %v1782_v0  ;;  %v1787_v10 = vrot.slane %v1770_v24, %v1786_v2 }
 0x17e   : > { %v965_v31 = vpop.f32.mrb[0].mxu0 }
 0x17f   : > { %v1006_v32 = vpop.f32.mrb[0].mxu1  ;;  %v967_v33 = vpop.f32.mrb[1].mxu0 }
 0x180   : > { %v1008_v35 = vpop.f32.mrb[1].mxu1  ;;  %v969_v13 = vpop.f32.mrb[2].mxu0 }
 0x181   : > { %v1010_v36 = vpop.f32.mrb[2].mxu1  ;;  %v970_v37 = vpop.f32.mrb[3].mxu0 }
 0x182   : > { %v1011_v38 = vpop.f32.mrb[3].mxu1 }
 0x1be   : > { %v1047_v39 = vpop.f32.mrb[4].mxu0 }
 0x1bf   : > { %v1677_v41 = vpop.f32.mrb[4].mxu1  ;;  %v1049_v44 = vpop.f32.mrb[5].mxu0  ;;  %v1832_v23 = vadd.f32 %v1825_v5, %v1047_v39 }
 0x1c0   : > { %v1766_v43 = vadd.f32 %v1677_v41, %v965_v31  ;;  %v1679_v45 = vpop.f32.mrb[5].mxu1  ;;  %v1051_v47 = vpop.f32.mrb[6].mxu0  ;;  %v1833_v28 = vadd.f32 %v1829_v7, %v1049_v44 }
 0x1c1   : > { %v1767_v46 = vadd.f32 %v1679_v45, %v967_v33  ;;  %v1681_v49 = vpop.f32.mrb[6].mxu1  ;;  %v1052_v50 = vpop.f32.mrb[7].mxu0 }
 0x1c2   : > { %v1682_v51 = vpop.f32.mrb[7].mxu1  ;;  %v1792_v55 = vadd.f32 %v1775_v52, %v1766_v43 }
 0x1c3   : > { %v1793_v56 = vadd.f32 %v1779_v54, %v1767_v46 }
 0x1c4   : > { %v2186_v57 = vmul.f32 -1.442695, %v1792_v55 }
 0x1c5   : > { %v2187_v58 = vmul.f32 -1.442695, %v1793_v56 }
 0x1c6   : > { %2548 = vpow2.f32 %v2186_v57 }
 0x1c7   : > { %2550 = vpow2.f32 %v2187_v58 }
 0x1d0   : > { %v2549_v59 = vpop.eup %2548 }
 0x1d1   : > { %v2551_v60 = vpop.eup %2550  ;;  %v1808_v61 = vadd.f32 1.0, %v2549_v59 }
 0x1d2   : > { %v1809_v62 = vadd.f32 1.0, %v2551_v60 }
 0x1d3   : > { %2552 = vrcp.f32 %v1808_v61 }
 0x1d4   : > { %2554 = vrcp.f32 %v1809_v62 }
 0x1dd   : > { %v2553_v17 = vpop.eup %2552 }
 0x1de   : > { %v2555_v22 = vpop.eup %2554 }
 0x1fe   : > { %v1718_v8 = vpop.f32.mrb[8].mxu0 }
 0x1ff   : > { %v1759_v9 = vpop.f32.mrb[8].mxu1  ;;  %v1768_v11 = vadd.f32 %v1718_v8, %v1006_v32  ;;  %v1720_v15 = vpop.f32.mrb[9].mxu0 }
 0x200   : > { %v1846_v12 = vadd.f32 %v1839_v3, %v1759_v9  ;;  %v1761_v16 = vpop.f32.mrb[9].mxu1  ;;  %v1769_v18 = vadd.f32 %v1720_v15, %v1008_v35  ;;  %v1722_v48 = vpop.f32.mrb[10].mxu0 }
 0x201   : > { %v1847_v20 = vadd.f32 %v1843_v4, %v1761_v16  ;;  %v1763_v21 = vpop.f32.mrb[10].mxu1  ;;  %v1794_v25 = vadd.f32 %v1783_v6, %v1768_v11  ;;  %v1723_v14 = vpop.f32.mrb[11].mxu0 }
 0x202   : > { %v1848_v26 = vmul.f32 %v2553_v17, %v1846_v12  ;;  %v1764_v27 = vpop.f32.mrb[11].mxu1  ;;  %v1795_v34 = vadd.f32 %v1787_v10, %v1769_v18 }
 0x203   : > { %v1849_v29 = vmul.f32 %v2555_v22, %v1847_v20  ;;  %v2188_v30 = vmul.f32 -1.442695, %v1794_v25 }
 0x204   : > { %v1850_v31 = vadd.f32 %v1848_v26, %v1832_v23  ;;  %v2189_v32 = vmul.f32 -1.442695, %v1795_v34 }
 0x205   : > { %v1851_v33 = vadd.f32 %v1849_v29, %v1833_v28  ;;  %2556 = vpow2.f32 %v2188_v30 }
 0x206   : > { %2558 = vpow2.f32 %v2189_v32 }
 0x20f   : > { %v2557_v13 = vpop.eup %2556 }
 0x210   : > { %v1810_v35 = vadd.f32 1.0, %v2557_v13  ;;  %v2559_v36 = vpop.eup %2558 }
 0x211   : > { %v1811_v37 = vadd.f32 1.0, %v2559_v36 }
 0x212   : > { %2560 = vrcp.f32 %v1810_v35 }
 0x213   : > { %2562 = vtanh.f32 %v1850_v31 }
 0x214   : > { %2564 = vrcp.f32 %v1811_v37 }
 0x215   : > { %2566 = vtanh.f32 %v1851_v33 }
 0x21c   : > { %v2561_v38 = vpop.eup %2560 }
 0x21d   : > { %v2563_v39 = vpop.eup %2562  ;;  %v1854_v41 = vsub.f32 1.0, %v2561_v38  ;;  %v1858_v46 = vmul.f32 %v2561_v38, %v2935_v19 }
 0x21e   : > { %v2565_v43 = vpop.eup %2564 }
 0x21f   : > { %v1855_v44 = vsub.f32 1.0, %v2565_v43  ;;  %v1856_v45 = vmul.f32 %v2563_v39, %v1854_v41  ;;  %v2567_v47 = vpop.eup %2566  ;;  %v1859_v50 = vmul.f32 %v2565_v43, %v2923_v40 }
 0x221   : > { %v1857_v49 = vmul.f32 %v2567_v47, %v1855_v44  ;;  %v1860_v51 = vadd.f32 %v1858_v46, %v1856_v45 }
 0x223   : > { %v1861_v24 = vadd.f32 %v1859_v50, %v1857_v49 }
 0x225   : > { %v1864_v52 = vcombine.low %v1860_v51, %v1861_v24 }
 0x227   : > { %v1871_v54 = vrot.slane %v1864_v52, %v2907_v53 }
 0x229   : > { %v1878_v55 = vrot.slane %v1871_v54, %v2907_v53 }
 0x22b   : > { %1884 = vst.msk [vmem:[#allocation2] sm:$0x3] %vm1882_vm1, %v1878_v55  ;;  %1885 = vst.msk [vmem:[%s311_s30] sm:$0x3] %vm1882_vm1, %v1878_v55 }
 0x22c   : > { %2649 = shalt.err (!%p2646_p5)
}
 0x22d   : > { %s2650_s24 = scalar_lea.hbm %s2975_s9, 32  ;;  %s2654_s18 = scalar_lea.hbm %s3029_s8, 256 }
 0x22e   : > { %p2651_p10 = scmp.ne.s32.totalorder %s2975_s9, %s2650_s24  ;;  %p2655_p0 = scmp.lt.u32.totalorder %s2975_s9, %s3029_s8 }
 0x22f   : > { %p2656_p4 = scmp.lt.u32.totalorder %s2654_s18, %s2650_s24  ;;  %p2658_p2 = scmp.lt.u32.totalorder %s2650_s24, %s2975_s9 }
 0x230   : > { %p2652_p6 = pnand %p2651_p10, %p3044_p7 }
 0x231   : > { %p2657_p1 = por %p2656_p4, %p2655_p0 }
 0x232   : > { %p2653_p11 = pneg %p2652_p6 }
 0x233   : > { %p2659_p8 = por %p2658_p2, %p2657_p1 }
 0x235   : > { %p2660_p9 = pnand %p2659_p8, %p2653_p11 }
 0x237   : > { %2663 = shalt.err (!%p2660_p9)
}
 0x238   : > { %2204 = dma.vmem_to_hbm [thread:$0]  (%p3044_p7), %s2977_s25, 32, %s2975_s9, %s1887_s13  }
 0x239 PF: > { %p2221_p12 = scmp.ge.s32.totalorder %s2708_s12, 2  ;;  %s1913_s22 = sand.u32 1, %s2696_s10  }
 0x23a   : > { %p3045_p13 = scmp.ne.s32.totalorder %s3035_s20, 0  ;;  %s1914_s28 = scalar_lea.sflag [#allocation7], %s1913_s22 }
 0x23c   : > { %p2214_p3 = pnand %p2221_p12, %p3045_p13 }
 0x23e   : > { %2691 = dma.done.wait (!%p2214_p3), %s1914_s28, 32  }
 0x23f   : > { %2693 = vsyncadd (!%p2214_p3), %s1914_s28, 4294967264  ;;  %s3046_s29 = sld [smem:[#allocation15_spill]]  ;;  %p26_p5 = scmp.ge.s32.totalorder %s2790_s15, 10  }
 0x240   : > { %s3047_s10 = smov %s2700_s0  ;;  %s3048_s0 = smov %s2704_s11 }
 0x241   : > { %s3050_s12 = smov %s2790_s15  ;;  %28 = sbr.rel (!%p26_p5) target bundleno = 20 (0x14), region = 96 }
 0x245   : > { %s3049_s11 = smov %s3046_s29 }
 0x248   :  { %1919 = vsyncpa [#allocation6], 1 }
 0x249   :  { %1921 = vsyncpa [#allocation6 + $0x1], 1 }
 0x24a   :  { %1922 = vsyncpa [#allocation9], 1 }
 0x24b   :  { %1923 = vsyncpa [#allocation7], 1 }
 0x24c   :  { %1925 = vsyncpa [#allocation7 + $0x1], 1 }

</bundles_post_ra>
